<compile_context>
chip_gen: v7x
topology: tpu7x:2x2x1
jax: 0.10.0
libtpu: 0.0.40
codegen_flags: <defaults>
</compile_context>

<pallas_src>
import math

import jax
import jax.numpy as jnp
import numpy as np
from jax.experimental import pallas as pl
from jax.experimental.pallas import tpu as pltpu

FEATURE_DIM = 32
HIDDEN_DIM = 32
N_CAMERA = 2
N_BUTTON = 22
N_ACTION = N_CAMERA + N_BUTTON          # 24
OUT_LANES = 128                         # lane-dense fused output width
LOGP_COL = N_ACTION                     # 24
ENT_COL = N_ACTION + 1                  # 25
BATCH = 8

_LOG_2PI = math.log(2.0 * math.pi)

# --- packed-parameter slab layouts -------------------------------------------
# Trunk slab A: (72, HIDDEN_DIM) f32
#   rows [0, 32)   : w1  (feature_dim -> hidden)
#   rows [32, 64)  : w2  (hidden -> hidden)
#   row  64        : b1
#   row  65        : b2
#   rows [66, 72)  : zero pad (multiple of 8 sublanes)
_B1_ROW = 2 * HIDDEN_DIM                # 64
_B2_ROW = 2 * HIDDEN_DIM + 1            # 65
_A_ROWS = 72

# Head slab B: (40, 128) f32
#   rows [0, 32)   : [w_camera | w_button] in lanes 0..23, lanes 24..127 zero
#   row  32        : [b_camera | b_button] in lanes 0..23
#   row  33        : camera_log_std in lanes 0..1
#   rows [34, 40)  : zero pad
_BO_ROW = HIDDEN_DIM                    # 32
_CLS_ROW = HIDDEN_DIM + 1               # 33
_B_ROWS = 40


def _policy_head_kernel(x_ref, a_ref, b_ref, rng_ref, out_ref):
    x = x_ref[...]                                                    # (B, 32)

    # --- MLP trunk: Linear -> ReLU -> Linear -> ReLU --------------------------
    h = jnp.dot(x, a_ref[0:HIDDEN_DIM, :], preferred_element_type=jnp.float32)
    h = jnp.maximum(h + a_ref[_B1_ROW:_B1_ROW + 1, :], 0.0)           # (B, 32)
    h = jnp.dot(h, a_ref[HIDDEN_DIM:2 * HIDDEN_DIM, :],
                preferred_element_type=jnp.float32)
    h = jnp.maximum(h + a_ref[_B2_ROW:_B2_ROW + 1, :], 0.0)           # (B, 32)

    # --- Fused heads, zero-padded to 128 lanes ---------------------------------
    # lanes 0-1: camera mean (pre-tanh); lanes 2-23: button logits; 24-127: 0
    out = (jnp.dot(h, b_ref[0:HIDDEN_DIM, :], preferred_element_type=jnp.float32)
           + b_ref[_BO_ROW:_BO_ROW + 1, :])                           # (B, 128)
    cls = b_ref[_CLS_ROW:_CLS_ROW + 1, :]                             # (1, 128)

    b = x.shape[0]
    col = jax.lax.broadcasted_iota(jnp.int32, (b, OUT_LANES), 1)
    is_cam = col < N_CAMERA
    is_btn = jnp.logical_and(col >= N_CAMERA, col < N_ACTION)

    rng = rng_ref[...]                   # lanes 0-1: N(0,1); 2-23: U[0,1); rest 0

    # --- Camera: tanh mean, Normal sample / 20 (col 0 additionally / 10) ------
    cam_mean = jnp.tanh(out)
    std = jnp.exp(cls)
    cam_sample = cam_mean + std * rng
    scale = jnp.where(col == 0, 1.0 / 200.0, 1.0 / 20.0)
    cam_action = cam_sample * scale

    # --- Buttons: Bernoulli(logits) sample; force button 0 -> 1, 13 -> 0 -------
    p = jax.nn.sigmoid(out)
    btn_sample = (rng < p).astype(jnp.float32)
    btn_action = jnp.where(col == N_CAMERA + 0, 1.0,
                 jnp.where(col == N_CAMERA + 13, 0.0, btn_sample))

    action = jnp.where(is_cam, cam_action,
             jnp.where(is_btn, btn_action, 0.0))                      # (B, 128)

    # --- Log-probabilities ------------------------------------------------------
    var = std * std
    cam_lp = -0.5 * (cam_action - cam_mean) ** 2 / var - cls - 0.5 * _LOG_2PI
    cam_lp_sum = jnp.sum(jnp.where(is_cam, cam_lp, 0.0), axis=-1, keepdims=True)

    softplus = jnp.maximum(out, 0.0) + jnp.log(1.0 + jnp.exp(-jnp.abs(out)))
    btn_lp = btn_action * out - softplus
    btn_lp_sum = jnp.sum(jnp.where(is_btn, btn_lp, 0.0), axis=-1, keepdims=True)
    logp = cam_lp_sum + btn_lp_sum                                    # (B, 1)

    # --- Entropies ---------------------------------------------------------------
    cam_ent = 0.5 + 0.5 * _LOG_2PI + cls                              # (1, 128)
    cam_ent_sum = jnp.sum(jnp.where(is_cam, cam_ent, 0.0), axis=-1, keepdims=True)
    btn_ent = softplus - p * out
    btn_ent_sum = jnp.sum(jnp.where(is_btn, btn_ent, 0.0), axis=-1, keepdims=True)
    ent = cam_ent_sum + btn_ent_sum                                   # (B, 1)

    # --- Single lane-dense fused output store -----------------------------------
    out_ref[...] = jnp.where(col < N_ACTION, action,
                   jnp.where(col == LOGP_COL, logp,
                   jnp.where(col == ENT_COL, ent, 0.0)))


def pack_params(params):
    """Pack logical PolicyHead params into the two kernel slabs."""
    a = jnp.zeros((_A_ROWS, HIDDEN_DIM), jnp.float32)
    a = a.at[0:HIDDEN_DIM, :].set(params["w1"])
    a = a.at[HIDDEN_DIM:2 * HIDDEN_DIM, :].set(params["w2"])
    a = a.at[_B1_ROW, :].set(params["b1"][0])
    a = a.at[_B2_ROW, :].set(params["b2"][0])

    b = jnp.zeros((_B_ROWS, OUT_LANES), jnp.float32)
    b = b.at[0:HIDDEN_DIM, 0:N_ACTION].set(params["wo"])
    b = b.at[_BO_ROW, 0:N_ACTION].set(params["bo"][0])
    b = b.at[_CLS_ROW, 0:N_CAMERA].set(params["cam_log_std"][0])
    return a, b


def policy_head_forward(x, trunk_slab, head_slab, key):
    """Returns (action (B,24), log_prob (B,), entropy (B,)) like PolicyHead.forward."""
    B = x.shape[0]
    k_n, k_u = jax.random.split(key)
    nrm = jax.random.normal(k_n, (B, N_CAMERA), jnp.float32)
    unif = jax.random.uniform(k_u, (B, N_BUTTON), jnp.float32)
    rng = jnp.concatenate(
        [nrm, unif, jnp.zeros((B, OUT_LANES - N_ACTION), jnp.float32)], axis=-1)

    vmem = pl.BlockSpec(memory_space=pltpu.MemorySpace.VMEM)
    fused = pl.pallas_call(
        _policy_head_kernel,
        out_shape=jax.ShapeDtypeStruct((B, OUT_LANES), jnp.float32),
        in_specs=[vmem, vmem, vmem, vmem],
        out_specs=vmem,
    )(x, trunk_slab, head_slab, rng)

    action = fused[:, :N_ACTION]
    log_prob = fused[:, LOGP_COL]
    entropy = fused[:, ENT_COL]
    return action, log_prob, entropy


policy_head_forward_jit = jax.jit(policy_head_forward)


def _init_params(key, feature_dim, hidden_dim):
    """Deterministic PyTorch-style (uniform +-1/sqrt(fan_in)) init."""
    ks = jax.random.split(key, 8)

    def lin(k_w, k_b, fan_in, fan_out):
        bound = 1.0 / math.sqrt(fan_in)
        w = jax.random.uniform(k_w, (fan_in, fan_out), jnp.float32, -bound, bound)
        b = jax.random.uniform(k_b, (1, fan_out), jnp.float32, -bound, bound)
        return w, b

    w1, b1 = lin(ks[0], ks[1], feature_dim, hidden_dim)
    w2, b2 = lin(ks[2], ks[3], hidden_dim, hidden_dim)
    w_cam, b_cam = lin(ks[4], ks[5], hidden_dim, N_CAMERA)
    w_btn, b_btn = lin(ks[6], ks[7], hidden_dim, N_BUTTON)
    wo = jnp.concatenate([w_cam, w_btn], axis=1)      # fused camera|button head
    bo = jnp.concatenate([b_cam, b_btn], axis=1)
    cam_log_std = jnp.zeros((1, N_CAMERA), jnp.float32)
    return dict(w1=w1, b1=b1, w2=w2, b2=b2, wo=wo, bo=bo,
                cam_log_std=cam_log_std)


def _reference_forward(x, params, key):
    """Pure-JAX reference with identical RNG usage, for a correctness check."""
    B = x.shape[0]
    k_n, k_u = jax.random.split(key)
    nrm = jax.random.normal(k_n, (B, N_CAMERA), jnp.float32)
    unif = jax.random.uniform(k_u, (B, N_BUTTON), jnp.float32)

    h = jnp.maximum(x @ params["w1"] + params["b1"], 0.0)
    h = jnp.maximum(h @ params["w2"] + params["b2"], 0.0)
    out = h @ params["wo"] + params["bo"]
    cam_mean = jnp.tanh(out[:, :N_CAMERA])
    btn_logits = out[:, N_CAMERA:]
    cam_std = jnp.exp(params["cam_log_std"])

    cam_action = (cam_mean + cam_std * nrm) / 20.0
    cam_action = cam_action.at[:, 0].divide(10.0)
    p = jax.nn.sigmoid(btn_logits)
    btn_action = (unif < p).astype(jnp.float32)
    btn_action = btn_action.at[:, 0].set(1.0).at[:, 13].set(0.0)

    cam_lp = (-0.5 * (cam_action - cam_mean) ** 2 / (cam_std ** 2)
              - params["cam_log_std"] - 0.5 * _LOG_2PI).sum(-1)
    sp = jnp.logaddexp(0.0, btn_logits)
    btn_lp = (btn_action * btn_logits - sp).sum(-1)
    ent = ((0.5 + 0.5 * _LOG_2PI + params["cam_log_std"]).sum()
           + (sp - p * btn_logits).sum(-1))
    action = jnp.concatenate([cam_action, btn_action], axis=-1)
    return action, cam_lp + btn_lp, ent


if __name__ == "__main__":
    root = jax.random.PRNGKey(0)
    k_param, k_x, k_sample = jax.random.split(root, 3)

    params = _init_params(k_param, FEATURE_DIM, HIDDEN_DIM)
    trunk_slab, head_slab = pack_params(params)       # one-time packing
    x = jax.random.normal(k_x, (BATCH, FEATURE_DIM), jnp.float32)

    action, log_prob, entropy = policy_head_forward_jit(x, trunk_slab, head_slab,
                                                        k_sample)
    jax.block_until_ready((action, log_prob, entropy))

    # sanity check against a pure-JAX reference using the same RNG draws
    a_ref, lp_ref, ent_ref = _reference_forward(x, params, k_sample)
    np.testing.assert_allclose(np.asarray(action), np.asarray(a_ref),
                               rtol=1e-5, atol=1e-5)
    np.testing.assert_allclose(np.asarray(log_prob), np.asarray(lp_ref),
                               rtol=1e-4, atol=1e-4)
    np.testing.assert_allclose(np.asarray(entropy), np.asarray(ent_ref),
                               rtol=1e-4, atol=1e-4)

    assert action.shape == (BATCH, N_ACTION)
    assert log_prob.shape == (BATCH,)
    assert entropy.shape == (BATCH,)
    print("KERNEL_OK")
</pallas_src>

<mosaic_0001>
module attributes {stable_mosaic.version = 11 : i64} {
  func.func @_policy_head_kernel(%arg0: memref<8x32xf32, #tpu.memory_space<vmem>>, %arg1: memref<72x32xf32, #tpu.memory_space<vmem>>, %arg2: memref<40x128xf32, #tpu.memory_space<vmem>>, %arg3: memref<8x128xf32, #tpu.memory_space<vmem>>, %arg4: memref<8x128xf32, #tpu.memory_space<vmem>>) attributes {dimension_semantics = [], scalar_prefetch = 0 : i64, scratch_operands = 0 : i64, tpu.core_type = #tpu.core_type<tc>} {
    %c0 = arith.constant 0 : index
    %c0_0 = arith.constant 0 : index
    %0 = vector.load %arg0[%c0, %c0_0] : memref<8x32xf32, #tpu.memory_space<vmem>>, vector<8x32xf32>
    %c0_1 = arith.constant 0 : index
    %c0_2 = arith.constant 0 : index
    %1 = vector.load %arg1[%c0_1, %c0_2] : memref<72x32xf32, #tpu.memory_space<vmem>>, vector<32x32xf32>
    %cst = arith.constant dense<0.000000e+00> : vector<8x32xf32>
    %2 = tpu.matmul %0, %1, %cst {dimension_numbers = #tpu.dot_dimension_numbers<[1], [0], [0], [1], [0, 0, 1, 1], [], []>} : vector<8x32xf32>, vector<32x32xf32>, vector<8x32xf32> -> vector<8x32xf32>
    %c64 = arith.constant 64 : index
    %c0_3 = arith.constant 0 : index
    %3 = vector.load %arg1[%c64, %c0_3] : memref<72x32xf32, #tpu.memory_space<vmem>>, vector<1x32xf32>
    %4 = vector.broadcast %3 : vector<1x32xf32> to vector<8x32xf32>
    %5 = arith.addf %2, %4 : vector<8x32xf32>
    %cst_4 = arith.constant 0.000000e+00 : f32
    %6 = vector.broadcast %cst_4 : f32 to vector<8x32xf32>
    %7 = arith.maximumf %5, %6 : vector<8x32xf32>
    %c32 = arith.constant 32 : index
    %c0_5 = arith.constant 0 : index
    %8 = vector.load %arg1[%c32, %c0_5] : memref<72x32xf32, #tpu.memory_space<vmem>>, vector<32x32xf32>
    %cst_6 = arith.constant dense<0.000000e+00> : vector<8x32xf32>
    %9 = tpu.matmul %7, %8, %cst_6 {dimension_numbers = #tpu.dot_dimension_numbers<[1], [0], [0], [1], [0, 0, 1, 1], [], []>} : vector<8x32xf32>, vector<32x32xf32>, vector<8x32xf32> -> vector<8x32xf32>
    %c65 = arith.constant 65 : index
    %c0_7 = arith.constant 0 : index
    %10 = vector.load %arg1[%c65, %c0_7] : memref<72x32xf32, #tpu.memory_space<vmem>>, vector<1x32xf32>
    %11 = vector.broadcast %10 : vector<1x32xf32> to vector<8x32xf32>
    %12 = arith.addf %9, %11 : vector<8x32xf32>
    %cst_8 = arith.constant 0.000000e+00 : f32
    %13 = vector.broadcast %cst_8 : f32 to vector<8x32xf32>
    %14 = arith.maximumf %12, %13 : vector<8x32xf32>
    %c0_9 = arith.constant 0 : index
    %c0_10 = arith.constant 0 : index
    %15 = vector.load %arg2[%c0_9, %c0_10] : memref<40x128xf32, #tpu.memory_space<vmem>>, vector<32x128xf32>
    %cst_11 = arith.constant dense<0.000000e+00> : vector<8x128xf32>
    %16 = tpu.matmul %14, %15, %cst_11 {dimension_numbers = #tpu.dot_dimension_numbers<[1], [0], [0], [1], [0, 0, 1, 1], [], []>} : vector<8x32xf32>, vector<32x128xf32>, vector<8x128xf32> -> vector<8x128xf32>
    %c32_12 = arith.constant 32 : index
    %c0_13 = arith.constant 0 : index
    %17 = vector.load %arg2[%c32_12, %c0_13] : memref<40x128xf32, #tpu.memory_space<vmem>>, vector<1x128xf32>
    %18 = vector.broadcast %17 : vector<1x128xf32> to vector<8x128xf32>
    %19 = arith.addf %16, %18 : vector<8x128xf32>
    %c33 = arith.constant 33 : index
    %c0_14 = arith.constant 0 : index
    %20 = vector.load %arg2[%c33, %c0_14] : memref<40x128xf32, #tpu.memory_space<vmem>>, vector<1x128xf32>
    %21 = tpu.iota {dimensions = array<i32: 1>} : vector<8x128xi32>
    %c2_i32 = arith.constant 2 : i32
    %22 = vector.broadcast %c2_i32 : i32 to vector<8x128xi32>
    %23 = arith.cmpi slt, %21, %22 : vector<8x128xi32>
    %c2_i32_15 = arith.constant 2 : i32
    %24 = vector.broadcast %c2_i32_15 : i32 to vector<8x128xi32>
    %25 = arith.cmpi sge, %21, %24 : vector<8x128xi32>
    %c24_i32 = arith.constant 24 : i32
    %26 = vector.broadcast %c24_i32 : i32 to vector<8x128xi32>
    %27 = arith.cmpi slt, %21, %26 : vector<8x128xi32>
    %28 = arith.andi %25, %27 : vector<8x128xi1>
    %c0_16 = arith.constant 0 : index
    %c0_17 = arith.constant 0 : index
    %29 = vector.load %arg3[%c0_16, %c0_17] : memref<8x128xf32, #tpu.memory_space<vmem>>, vector<8x128xf32>
    %30 = math.tanh %19 : vector<8x128xf32>
    %31 = math.exp %20 : vector<1x128xf32>
    %32 = vector.broadcast %31 : vector<1x128xf32> to vector<8x128xf32>
    %33 = arith.mulf %32, %29 : vector<8x128xf32>
    %34 = arith.addf %30, %33 : vector<8x128xf32>
    %c0_i32 = arith.constant 0 : i32
    %35 = vector.broadcast %c0_i32 : i32 to vector<8x128xi32>
    %36 = arith.cmpi eq, %21, %35 : vector<8x128xi32>
    %cst_18 = arith.constant 5.000000e-03 : f32
    %cst_19 = arith.constant 5.000000e-02 : f32
    %37 = vector.broadcast %cst_18 : f32 to vector<8x128xf32>
    %38 = vector.broadcast %cst_19 : f32 to vector<8x128xf32>
    %39 = arith.select %36, %37, %38 : vector<8x128xi1>, vector<8x128xf32>
    %40 = arith.mulf %34, %39 : vector<8x128xf32>
    %41 = arith.negf %19 : vector<8x128xf32>
    %42 = math.exp %41 : vector<8x128xf32>
    %cst_20 = arith.constant 1.000000e+00 : f32
    %43 = vector.broadcast %cst_20 : f32 to vector<8x128xf32>
    %44 = arith.addf %43, %42 : vector<8x128xf32>
    %45 = arith.divf %43, %44 : vector<8x128xf32>
    %46 = arith.cmpf olt, %29, %45 : vector<8x128xf32>
    %47 = arith.extui %46 : vector<8x128xi1> to vector<8x128xi32>
    %48 = arith.sitofp %47 : vector<8x128xi32> to vector<8x128xf32>
    %c2_i32_21 = arith.constant 2 : i32
    %49 = vector.broadcast %c2_i32_21 : i32 to vector<8x128xi32>
    %50 = arith.cmpi eq, %21, %49 : vector<8x128xi32>
    %c15_i32 = arith.constant 15 : i32
    %51 = vector.broadcast %c15_i32 : i32 to vector<8x128xi32>
    %52 = arith.cmpi eq, %21, %51 : vector<8x128xi32>
    %cst_22 = arith.constant 0.000000e+00 : f32
    %53 = vector.broadcast %cst_22 : f32 to vector<8x128xf32>
    %54 = arith.select %52, %53, %48 : vector<8x128xi1>, vector<8x128xf32>
    %cst_23 = arith.constant 1.000000e+00 : f32
    %55 = vector.broadcast %cst_23 : f32 to vector<8x128xf32>
    %56 = arith.select %50, %55, %54 : vector<8x128xi1>, vector<8x128xf32>
    %cst_24 = arith.constant 0.000000e+00 : f32
    %57 = vector.broadcast %cst_24 : f32 to vector<8x128xf32>
    %58 = arith.select %28, %56, %57 : vector<8x128xi1>, vector<8x128xf32>
    %59 = arith.select %23, %40, %58 : vector<8x128xi1>, vector<8x128xf32>
    %60 = arith.mulf %31, %31 : vector<1x128xf32>
    %61 = arith.subf %40, %30 : vector<8x128xf32>
    %62 = arith.mulf %61, %61 : vector<8x128xf32>
    %cst_25 = arith.constant -5.000000e-01 : f32
    %63 = vector.broadcast %cst_25 : f32 to vector<8x128xf32>
    %64 = arith.mulf %63, %62 : vector<8x128xf32>
    %65 = vector.broadcast %60 : vector<1x128xf32> to vector<8x128xf32>
    %66 = arith.divf %64, %65 : vector<8x128xf32>
    %67 = vector.broadcast %20 : vector<1x128xf32> to vector<8x128xf32>
    %68 = arith.subf %66, %67 : vector<8x128xf32>
    %cst_26 = arith.constant 0.918938517 : f32
    %69 = vector.broadcast %cst_26 : f32 to vector<8x128xf32>
    %70 = arith.subf %68, %69 : vector<8x128xf32>
    %cst_27 = arith.constant 0.000000e+00 : f32
    %71 = vector.broadcast %cst_27 : f32 to vector<8x128xf32>
    %72 = arith.select %23, %70, %71 : vector<8x128xi1>, vector<8x128xf32>
    %cst_28 = arith.constant dense<0.000000e+00> : vector<8xf32>
    %73 = vector.multi_reduction <add>, %72, %cst_28 [1] : vector<8x128xf32> to vector<8xf32>
    %74 = vector.shape_cast %73 : vector<8xf32> to vector<8x1xf32>
    %cst_29 = arith.constant 0.000000e+00 : f32
    %75 = vector.broadcast %cst_29 : f32 to vector<8x128xf32>
    %76 = arith.maximumf %19, %75 : vector<8x128xf32>
    %77 = math.absf %19 : vector<8x128xf32>
    %cst_30 = arith.constant 0.000000e+00 : f32
    %78 = vector.broadcast %cst_30 : f32 to vector<8x128xf32>
    %79 = arith.subf %78, %77 : vector<8x128xf32>
    %80 = math.exp %79 : vector<8x128xf32>
    %cst_31 = arith.constant 1.000000e+00 : f32
    %81 = vector.broadcast %cst_31 : f32 to vector<8x128xf32>
    %82 = arith.addf %81, %80 : vector<8x128xf32>
    %83 = math.log %82 : vector<8x128xf32>
    %84 = arith.addf %76, %83 : vector<8x128xf32>
    %85 = arith.mulf %56, %19 : vector<8x128xf32>
    %86 = arith.subf %85, %84 : vector<8x128xf32>
    %cst_32 = arith.constant 0.000000e+00 : f32
    %87 = vector.broadcast %cst_32 : f32 to vector<8x128xf32>
    %88 = arith.select %28, %86, %87 : vector<8x128xi1>, vector<8x128xf32>
    %cst_33 = arith.constant dense<0.000000e+00> : vector<8xf32>
    %89 = vector.multi_reduction <add>, %88, %cst_33 [1] : vector<8x128xf32> to vector<8xf32>
    %90 = vector.shape_cast %89 : vector<8xf32> to vector<8x1xf32>
    %91 = arith.addf %74, %90 : vector<8x1xf32>
    %cst_34 = arith.constant 1.41893852 : f32
    %92 = vector.broadcast %cst_34 : f32 to vector<1x128xf32>
    %93 = arith.addf %92, %20 : vector<1x128xf32>
    %cst_35 = arith.constant 0.000000e+00 : f32
    %94 = vector.shape_cast %93 : vector<1x128xf32> to vector<1x128xf32>
    %95 = vector.broadcast %94 : vector<1x128xf32> to vector<8x128xf32>
    %96 = vector.broadcast %cst_35 : f32 to vector<8x128xf32>
    %97 = arith.select %23, %95, %96 : vector<8x128xi1>, vector<8x128xf32>
    %cst_36 = arith.constant dense<0.000000e+00> : vector<8xf32>
    %98 = vector.multi_reduction <add>, %97, %cst_36 [1] : vector<8x128xf32> to vector<8xf32>
    %99 = vector.shape_cast %98 : vector<8xf32> to vector<8x1xf32>
    %100 = arith.mulf %45, %19 : vector<8x128xf32>
    %101 = arith.subf %84, %100 : vector<8x128xf32>
    %cst_37 = arith.constant 0.000000e+00 : f32
    %102 = vector.broadcast %cst_37 : f32 to vector<8x128xf32>
    %103 = arith.select %28, %101, %102 : vector<8x128xi1>, vector<8x128xf32>
    %cst_38 = arith.constant dense<0.000000e+00> : vector<8xf32>
    %104 = vector.multi_reduction <add>, %103, %cst_38 [1] : vector<8x128xf32> to vector<8xf32>
    %105 = vector.shape_cast %104 : vector<8xf32> to vector<8x1xf32>
    %106 = arith.addf %99, %105 : vector<8x1xf32>
    %c24_i32_39 = arith.constant 24 : i32
    %107 = vector.broadcast %c24_i32_39 : i32 to vector<8x128xi32>
    %108 = arith.cmpi slt, %21, %107 : vector<8x128xi32>
    %c24_i32_40 = arith.constant 24 : i32
    %109 = vector.broadcast %c24_i32_40 : i32 to vector<8x128xi32>
    %110 = arith.cmpi eq, %21, %109 : vector<8x128xi32>
    %c25_i32 = arith.constant 25 : i32
    %111 = vector.broadcast %c25_i32 : i32 to vector<8x128xi32>
    %112 = arith.cmpi eq, %21, %111 : vector<8x128xi32>
    %cst_41 = arith.constant 0.000000e+00 : f32
    %113 = vector.shape_cast %106 : vector<8x1xf32> to vector<8x1xf32>
    %114 = vector.broadcast %113 : vector<8x1xf32> to vector<8x128xf32>
    %115 = vector.broadcast %cst_41 : f32 to vector<8x128xf32>
    %116 = arith.select %112, %114, %115 : vector<8x128xi1>, vector<8x128xf32>
    %117 = vector.shape_cast %91 : vector<8x1xf32> to vector<8x1xf32>
    %118 = vector.broadcast %117 : vector<8x1xf32> to vector<8x128xf32>
    %119 = arith.select %110, %118, %116 : vector<8x128xi1>, vector<8x128xf32>
    %120 = arith.select %108, %59, %119 : vector<8x128xi1>, vector<8x128xf32>
    %c0_42 = arith.constant 0 : index
    %c0_43 = arith.constant 0 : index
    %121 = vector.load %arg4[%c0_42, %c0_43] : memref<8x128xf32, #tpu.memory_space<vmem>>, vector<8x128xf32>
    tpu.vector_store %arg4[%c0_42, %c0_43], %120 {strides = array<i32>} : memref<8x128xf32, #tpu.memory_space<vmem>>, vector<8x128xf32>,
    return
  }
}

</mosaic_0001>

<bundles_post_ra>
// kernel: policy_head_forward.3
= control target key start
LH: loop header
LB: loop body
LE: loop exit
PB: predicated region body
PF: predicated region fallthrough
CT: control target
= control target key end

     0   :  { %v453_v0 = vmov 0.0|0.0   ;;  %vm454_vm0 = vmmov 0   ;;  %v455_v4 = vmov 0.0   ;;  %vm27_vm1 = vcmask 261120   ;;  %s579_s1 = inlined_call_operand.vmem [shape: f32[72,32], index: 1, kind: input, shape index: {}]   ;;  %s580_s0 = inlined_call_operand.vmem [shape: f32[8,32], index: 0, kind: input, shape index: {}]   ;;  %s581_s2 = inlined_call_operand.vmem [shape: f32[40,128], index: 2, kind: input, shape index: {}]   ;;  %s582_s3 = inlined_call_operand.vmem [shape: f32[8,128], index: 3, kind: input, shape index: {}]   ;;  %s583_s4 = inlined_call_operand.vmem [shape: f32[8,128], index: 4, kind: output, shape index: {}]  }
   0x1   :  { %417 = vmatprep.subr.bf16.mxu0 %v453_v0  ;;  %v18_v1 = vld [vmem:[%s579_s1] sm:$0xff]  ;;  %v19_v2 = vld [vmem:[%s579_s1 + $0x8] sm:$0xff]  ;;  %v20_v3 = vld [vmem:[%s579_s1 + $0x10] sm:$0xff]  ;;  %392 = vmatprep.mubr.msk.f32.mxu0 %vm454_vm0, %v455_v4  ;;  %v268_v33 = vlaneseq  ;;  %v456_v56 = vmov 0.05  }
   0x2   :  { %v418_v5 = vpack.c.bf16 %v19_v2, %v18_v1  ;;  %v21_v6 = vld [vmem:[%s579_s1 + $0x18] sm:$0xff]  ;;  %423 = vmatprep.subr.bf16.mxu1 %v453_v0  ;;  %v102_v7 = vld [vmem:[%s579_s1 + $0x20] sm:$0xff]  ;;  %403 = vmatprep.mubr.msk.f32.mxu1 %vm454_vm0, %v455_v4  ;;  %v103_v8 = vld [vmem:[%s579_s1 + $0x28] sm:$0xff] }
   0x3   :  { %v421_v9 = vpack.c.bf16 %v21_v6, %v20_v3  ;;  %v424_v10 = vpack.c.bf16 %v103_v8, %v102_v7  ;;  %v17_v11 = vld [vmem:[%s580_s0] sm:$0xff]  ;;  %v104_v12 = vld [vmem:[%s579_s1 + $0x30] sm:$0xff]  ;;  %v105_v13 = vld [vmem:[%s579_s1 + $0x38] sm:$0xff]  ;;  %v279_v34 = vshrl.u32 %v268_v33, 7  ;;  %v539_v42 = vand.u32 127, %v268_v33 }
   0x4   :  { %419 = vmatpush3.bf16.msra.mxu0 %v418_v5  ;;  %v427_v14 = vpack.c.bf16 %v105_v13, %v104_v12  ;;  %v185_v15 = vld [vmem:[%s581_s2] sm:$0xff]  ;;  %v186_v16 = vld [vmem:[%s581_s2 + $0x8] sm:$0xff]  ;;  %v187_v23 = vld [vmem:[%s581_s2 + $0x10] sm:$0xff] }
   0x5   :  { %420 = vmatprep.subr.bf16.mxu0 %v453_v0  ;;  %425 = vmatpush3.bf16.msra.mxu1 %v424_v10  ;;  %v430_v17 = vpack.c.bf16 %v186_v16, %v185_v15  ;;  %v360_v18 = vld [vmem:[%s579_s1 + $0x40] ss:$0 sm:$0xff]  ;;  %v188_v24 = vld [vmem:[%s581_s2 + $0x18] sm:$0xff]  ;;  %v362_v26 = vld [vmem:[%s579_s1 + $0x41] ss:$0 sm:$0xff]  ;;  %v280_v35 = vsub.s32 0, %v279_v34 }
   0x6   :  { %426 = vmatprep.subr.bf16.mxu1 %v453_v0  ;;  %v433_v25 = vpack.c.bf16 %v188_v24, %v187_v23  ;;  %v267_v31 = vld [vmem:[%s581_s2 + $0x21] sm:$0x1]  ;;  %vm270_vm2 = vcmp.lt.s32.totalorder %v539_v42, 2  ;;  %v364_v45 = vld [vmem:[%s581_s2 + $0x20] ss:$0 sm:$0xff]  ;;  %vm284_vm3 = vcmp.eq.s32.totalorder %v539_v42, 0 }
   0x7   :  { %v276_v32 = vmul.f32 1.442695, %v267_v31  ;;  %v315_v40 = vrot.slane %v267_v31, %v280_v35  ;;  %v336_v41 = vadd.f32 1.4189385, %v267_v31  ;;  %v274_v52 = vld [vmem:[%s582_s3] sm:$0xff]  ;;  %vm271_vm4 = vcmp.ge.s32.totalorder %v539_v42, 2 }
   0x8   :  { %422 = vmatpush3.bf16.msra.mxu0 %v421_v9  ;;  %v285_v57 = vsel %vm284_vm3, 0.005, %v456_v56  ;;  %vm272_vm5 = vcmp.lt.s32.totalorder %v539_v42, 24  ;;  %vm297_vm6 = vcmp.eq.s32.totalorder %v539_v42, 15  ;;  %vm296_vm7 = vcmp.eq.s32.totalorder %v539_v42, 2 }
   0x9   :  { %429 = vmatprep.subr.bf16.mxu0 %v453_v0  ;;  %428 = vmatpush3.bf16.msra.mxu1 %v427_v14  ;;  %439 = vpow2.f32 %v276_v32  ;;  %v340_v43 = vrot.slane %v336_v41, %v280_v35  ;;  %vm559_vm9 = vmand %vm271_vm4, %vm272_vm5  ;;  %vm351_vm10 = vcmp.eq.s32.totalorder %v539_v42, 25  ;;  %vm350_vm11 = vcmp.eq.s32.totalorder %v539_v42, 24 }
   0xb   :  { %393 = vmatmul.mubr.msk.f32.vlgmr.msra.gmra.mrb[0].mxu0 %vm27_vm1, %v17_v11  ;;  %v341_v44 = vsel %vm270_vm2, %v340_v43, 0.0 }
   0xc   :  { %414 = vmatprep.mubr.msk.f32.mxu0 %vm454_vm0, %v455_v4  ;;  %431 = vmatpush3.bf16.msra.mxu0 %v430_v17 }
   0xd   :  { %432 = vmatprep.subr.bf16.mxu0 %v453_v0  ;;  %342 = vadd.xlane.f32.xlu0 %v341_v44 }
  0x10   :  { %434 = vmatpush3.bf16.msra.mxu0 %v433_v25 }
  0x13   :  { %v440_v36 = vpop.eup %439 }
  0x14   :  { %v281_v37 = vrot.slane %v440_v36, %v280_v35  ;;  %v302_v38 = vmul.f32 %v440_v36, %v440_v36 }
  0x16   :  { %v309_v39 = vrot.slane %v302_v38, %v280_v35  ;;  %v282_v54 = vmul.f32 %v281_v37, %v274_v52 }
  0x9a   :  { %v343_v25 = vpop.xlane.xlu0 %342 }
  0xde   :  { %v97_v19 = vpop.f32.mrb[0].mxu0 }
  0xdf   :  { %v98_v20 = vadd.f32 %v360_v18, %v97_v19  ;;  %v394_v21 = vpop.f32.mrb[1].mxu0 }
  0xe1   :  { %v101_v22 = vmax.f32 %v98_v20, 0.0 }
  0xe3   :  { %404 = vmatmul.mubr.msk.f32.vlgmr.msra.gmra.mrb[0].mxu1 %vm27_vm1, %v101_v22 }
 0x1b6   :  { %v180_v27 = vpop.f32.mrb[0].mxu1 }
 0x1b7   :  { %v181_v28 = vadd.f32 %v362_v26, %v180_v27  ;;  %v405_v29 = vpop.f32.mrb[1].mxu1 }
 0x1b9   :  { %v184_v30 = vmax.f32 %v181_v28, 0.0 }
 0x1bb   :  { %415 = vmatmul.mubr.msk.f32.vlgmr.msra.gmra.mrb[2].mxu0 %vm27_vm1, %v184_v30 }
 0x28e   :  { %v263_v46 = vpop.f32.mrb[2].mxu0 }
 0x28f   :  { %v264_v47 = vadd.f32 %v364_v45, %v263_v46  ;;  %v416_v48 = vpop.f32.mrb[3].mxu0 }
 0x291   :  { %v366_v49 = vmul.f32 -1.442695, %v264_v47  ;;  %441 = vtanh.f32 %v264_v47  ;;  %v322_v50 = vand.u32 2147483647, %v264_v47  ;;  %v321_v15 = vmax.f32 %v264_v47, 0.0 }
 0x293   :  { %443 = vpow2.f32 %v366_v49  ;;  %v323_v51 = vsub.f32 0.0, %v322_v50 }
 0x295   :  { %v324_v53 = vmul.f32 1.442695, %v323_v51 }
 0x297   :  { %445 = vpow2.f32 %v324_v53 }
 0x298   :  { %447 = vrcp.f32 %v309_v39 }
 0x29b   :  { %v442_v55 = vpop.eup %441 }
 0x29c   :  { %v283_v58 = vadd.f32 %v442_v55, %v282_v54 }
 0x29d   :  { %v444_v59 = vpop.eup %443 }
 0x29e   :  { %v286_v60 = vmul.f32 %v285_v57, %v283_v58  ;;  %v290_v61 = vadd.f32 1.0, %v444_v59 }
 0x2a0   :  { %v303_v62 = vsub.f32 %v286_v60, %v442_v55  ;;  %449 = vrcp.f32 %v290_v61 }
 0x2a1   :  { %v446_v63 = vpop.eup %445 }
 0x2a2   :  { %v304_v0 = vmul.f32 %v303_v62, %v303_v62  ;;  %v326_v1 = vadd.f32 1.0, %v446_v63  ;;  %v448_v2 = vpop.eup %447 }
 0x2a4   :  { %v305_v3 = vmul.f32 -0.5, %v304_v0  ;;  %451 = vlog2.f32 %v326_v1 }
 0x2a6   :  { %v311_v5 = vmul.f32 %v448_v2, %v305_v3 }
 0x2a8   :  { %v316_v6 = vsub.f32 %v311_v5, %v315_v40 }
 0x2aa   :  { %v450_v7 = vpop.eup %449  ;;  %v368_v8 = vadd.f32 -0.9189385, %v316_v6 }
 0x2ab   :  { %vm293_vm8 = vcmp.lt.f32.partialorder %v274_v52, %v450_v7  ;;  %v344_v20 = vmul.f32 %v450_v7, %v264_v47 }
 0x2ac   :  { %v318_v9 = vsel %vm270_vm2, %v368_v8, 0.0  ;;  %v367_v11 = vsel %vm293_vm8, 1.0, %v455_v4 }
 0x2ad   :  { %319 = vadd.xlane.f32.xlu1 %v318_v9  ;;  %v298_v12 = vsel %vm297_vm6, 0.0, %v367_v11 }
 0x2ae   :  { %v452_v13 = vpop.eup %451  ;;  %v299_v14 = vsel %vm296_vm7, 1.0, %v298_v12 }
 0x2af   :  { %v328_v16 = vmul.f32 0.6931472, %v452_v13  ;;  %v300_v17 = vsel %vm559_vm9, %v299_v14, 0.0  ;;  %v330_v21 = vmul.f32 %v299_v14, %v264_v47 }
 0x2b0   :  { %v301_v18 = vsel %vm270_vm2, %v286_v60, %v300_v17 }
 0x2b1   :  { %v329_v19 = vadd.f32 %v328_v16, %v321_v15 }
 0x2b3   :  { %v345_v22 = vsub.f32 %v329_v19, %v344_v20  ;;  %v331_v23 = vsub.f32 %v330_v21, %v329_v19 }
 0x2b5   :  { %v346_v4 = vsel %vm559_vm9, %v345_v22, 0.0  ;;  %v332_v24 = vsel %vm559_vm9, %v331_v23, 0.0 }
 0x2b6   :  { %347 = vadd.xlane.f32.xlu0 %v346_v4  ;;  %333 = vadd.xlane.f32.xlu1 %v332_v24 }
 0x33a   :  { %v320_v26 = vpop.xlane.xlu1 %319 }
 0x343   :  { %v348_v27 = vpop.xlane.xlu0 %347  ;;  %v334_v28 = vpop.xlane.xlu1 %333 }
 0x344   :  { %v349_v29 = vadd.f32 %v348_v27, %v343_v25  ;;  %v335_v30 = vadd.f32 %v334_v28, %v320_v26 }
 0x346   :  { %v352_v31 = vsel %vm351_vm10, %v349_v29, 0.0 }
 0x347   :  { %v353_v32 = vsel %vm350_vm11, %v335_v30, %v352_v31 }
 0x348   :  { %v354_v33 = vsel %vm272_vm5, %v301_v18, %v353_v32 }
 0x349   :  { %355 = vst [vmem:[%s583_s4] sm:$0xff] %v354_v33 }

</bundles_post_ra>
